<compile_context>
chip_gen: v6e
topology: v6e:2x2x1
jax: 0.10.0
libtpu: 0.0.40
codegen_flags: <defaults>
</compile_context>

<pallas_src>
from dataclasses import dataclass
from functools import partial
from typing import Optional

import jax
import jax.numpy as jnp
from jax.experimental import pallas as pl
from jax.experimental.pallas import tpu as pltpu


# ------------------------------- helpers -----------------------------------

def _round_up(x: int, m: int) -> int:
    return ((x + m - 1) // m) * m


def _pad_to(a, shape):
    return jnp.pad(a, [(0, s - d) for d, s in zip(a.shape, shape)])


# ---------------------------- Pallas kernels --------------------------------

def _mlp_compute(x_ref, w1_ref, b1_ref, w2_ref, b2_ref, w3_ref, b3_ref):
    """Linear -> ReLU -> Linear -> ReLU -> Linear on one (TM, K) row tile.

    Dots run on the MXU in the weights' dtype (bf16 by default) with f32
    accumulation; bias-add / ReLU are f32 on the VPU.
    """
    cd = w1_ref.dtype
    h = jnp.dot(x_ref[...], w1_ref[...], preferred_element_type=jnp.float32)
    h = jnp.maximum(h + b1_ref[...], 0.0)
    h = jnp.dot(h.astype(cd), w2_ref[...], preferred_element_type=jnp.float32)
    h = jnp.maximum(h + b2_ref[...], 0.0)
    logits = jnp.dot(h.astype(cd), w3_ref[...], preferred_element_type=jnp.float32)
    return logits + b3_ref[...]


def _mlp_kernel(x_ref, w1_ref, b1_ref, w2_ref, b2_ref, w3_ref, b3_ref, logits_ref):
    logits_ref[...] = _mlp_compute(
        x_ref, w1_ref, b1_ref, w2_ref, b2_ref, w3_ref, b3_ref
    ).astype(logits_ref.dtype)


def _mlp_ce_kernel(x_ref, t_ref, w1_ref, b1_ref, w2_ref, b2_ref, w3_ref, b3_ref,
                   logits_ref, loss_ref, *, num_classes):
    """Fused MLP + per-row cross-entropy (ignore_index = -1).

    Only the first `num_classes` logit columns are real; the rest are zero
    padding and are masked out of the log-sum-exp. Rows with target == -1 get
    a per-row loss of 0 and are excluded from the mean in the wrapper.
    """
    logits = _mlp_compute(x_ref, w1_ref, b1_ref, w2_ref, b2_ref, w3_ref, b3_ref)
    logits_ref[...] = logits.astype(logits_ref.dtype)

    tm, c_pad = logits.shape
    col = jax.lax.broadcasted_iota(jnp.int32, (tm, c_pad), 1)
    masked = jnp.where(col < num_classes, logits, jnp.float32(-1e30))
    m = jnp.max(masked, axis=-1, keepdims=True)
    lse = m + jnp.log(jnp.sum(jnp.exp(masked - m), axis=-1, keepdims=True))

    tgt = t_ref[...]                                              # (TM, 1) int32
    picked = jnp.sum(jnp.where(col == tgt, logits, 0.0), axis=-1, keepdims=True)
    valid = tgt != -1
    loss_ref[...] = jnp.where(valid, lse - picked, 0.0)


# ------------------------------ JAX wrapper ----------------------------------

@dataclass
class Output:
    loss: Optional[jax.Array]
    logits: jax.Array


def init_params(key, in_dim, hid_dim, out_dim):
    """PyTorch-style uniform(-1/sqrt(fan_in), 1/sqrt(fan_in)); W stored (in, out)."""
    def linear(k, fan_in, fan_out):
        k1, k2 = jax.random.split(k)
        bound = 1.0 / float(fan_in) ** 0.5
        w = jax.random.uniform(k1, (fan_in, fan_out), jnp.float32, -bound, bound)
        b = jax.random.uniform(k2, (1, fan_out), jnp.float32, -bound, bound)
        return w, b

    k1, k2, k3 = jax.random.split(key, 3)
    w1, b1 = linear(k1, in_dim, hid_dim)
    w2, b2 = linear(k2, hid_dim, hid_dim)
    w3, b3 = linear(k3, hid_dim, out_dim)
    return (w1, b1, w2, b2, w3, b3)


def _vmem_limit_bytes(tm, k, h, c, w_itemsize):
    weights = (k * h + h * h + h * c) * w_itemsize + (2 * h + c) * 4
    # double-buffered streaming tiles (narrow last dims lane-pad to 128 in VMEM)
    per_step = tm * k * w_itemsize + tm * 128 * 4 + tm * c * 4 + tm * 128 * 4
    interm = 2 * tm * h * 4                      # spilled f32 activations
    need = weights + 2 * per_step + interm
    # >= v6e default scoped limit, <= v7x physical VMEM per TensorCore.
    return int(min(64 * 1024 * 1024, max(32 * 1024 * 1024, 2 * need)))


def network_b_forward(params, inputs, targets=None, return_dict=True, *,
                      block_rows=256, compute_dtype=jnp.bfloat16):
    w1, b1, w2, b2, w3, b3 = params
    in_dim, hid_dim = w1.shape
    out_dim = w3.shape[1]
    B = inputs.shape[0]

    # Pad feature dims to 128 (lane-dense MXU passes + unmasked stores) and the
    # batch up to a multiple of the row tile.
    K = _round_up(in_dim, 128)
    H = _round_up(hid_dim, 128)
    C = _round_up(out_dim, 128)
    TM = min(_round_up(block_rows, 16), _round_up(B, 16))
    Bp = _round_up(B, TM)
    grid = (Bp // TM,)

    x_p = jnp.zeros((Bp, K), compute_dtype).at[:B, :in_dim].set(
        inputs.astype(compute_dtype))
    w1_p = _pad_to(w1, (K, H)).astype(compute_dtype)
    w2_p = _pad_to(w2, (H, H)).astype(compute_dtype)
    w3_p = _pad_to(w3, (H, C)).astype(compute_dtype)
    b1_p = _pad_to(b1, (1, H)).astype(jnp.float32)
    b2_p = _pad_to(b2, (1, H)).astype(jnp.float32)
    b3_p = _pad_to(b3, (1, C)).astype(jnp.float32)

    row = lambda n: pl.BlockSpec((TM, n), lambda i: (i, 0))          # streamed
    res = lambda s: pl.BlockSpec(s, lambda i: (0, 0))                # VMEM-resident
    weight_specs = [res((K, H)), res((1, H)), res((H, H)), res((1, H)),
                    res((H, C)), res((1, C))]
    compiler_params = pltpu.CompilerParams(
        dimension_semantics=("parallel",),
        vmem_limit_bytes=_vmem_limit_bytes(
            TM, K, H, C, jnp.dtype(compute_dtype).itemsize))

    loss = None
    if targets is not None:
        t_flat = targets.reshape(-1).astype(jnp.int32)
        t_p = jnp.full((Bp, 1), -1, jnp.int32).at[:B, 0].set(t_flat)
        logits_p, per_row = pl.pallas_call(
            partial(_mlp_ce_kernel, num_classes=out_dim),
            grid=grid,
            in_specs=[row(K), row(1)] + weight_specs,
            out_specs=(row(C), row(1)),
            out_shape=(jax.ShapeDtypeStruct((Bp, C), jnp.float32),
                       jax.ShapeDtypeStruct((Bp, 1), jnp.float32)),
            compiler_params=compiler_params,
        )(x_p, t_p, w1_p, b1_p, w2_p, b2_p, w3_p, b3_p)
        # Mean over valid rows; if every target is -1 this is 0/0 -> NaN, which
        # matches torch.nn.functional.cross_entropy with ignore_index=-1.
        count = jnp.sum(t_flat != -1).astype(jnp.float32)
        loss = jnp.sum(per_row[:, 0]) / count
    else:
        logits_p = pl.pallas_call(
            _mlp_kernel,
            grid=grid,
            in_specs=[row(K)] + weight_specs,
            out_specs=row(C),
            out_shape=jax.ShapeDtypeStruct((Bp, C), jnp.float32),
            compiler_params=compiler_params,
        )(x_p, w1_p, b1_p, w2_p, b2_p, w3_p, b3_p)

    logits = logits_p[:B, :out_dim]
    if not return_dict:
        return (loss, logits)
    return Output(loss=loss, logits=logits)


# -------------------------------- reference ----------------------------------

def _reference(params, inputs, targets, compute_dtype=jnp.float32):
    """Plain-JAX reference; compute_dtype=bfloat16 mirrors the kernel's MXU casts."""
    w1, b1, w2, b2, w3, b3 = params
    cd, f32 = compute_dtype, jnp.float32
    h = jnp.maximum(jnp.dot(inputs.astype(cd), w1.astype(cd),
                            preferred_element_type=f32) + b1, 0.0)
    h = jnp.maximum(jnp.dot(h.astype(cd), w2.astype(cd),
                            preferred_element_type=f32) + b2, 0.0)
    logits = jnp.dot(h.astype(cd), w3.astype(cd), preferred_element_type=f32) + b3
    t = targets.reshape(-1)
    lse = jax.scipy.special.logsumexp(logits, axis=-1)
    picked = jnp.take_along_axis(logits, jnp.clip(t, 0, None)[:, None], axis=-1)[:, 0]
    valid = t != -1
    loss = jnp.sum(jnp.where(valid, lse - picked, 0.0)) / jnp.sum(valid)
    return loss, logits


# ----------------------------------- main ------------------------------------

if __name__ == "__main__":
    B, IN_DIM, HID_DIM, OUT_DIM = 8, 32, 32, 16

    key = jax.random.PRNGKey(0)
    k_params, k_x, k_t = jax.random.split(key, 3)

    params = init_params(k_params, IN_DIM, HID_DIM, OUT_DIM)
    x = jax.random.normal(k_x, (B, IN_DIM), jnp.float32)
    targets = jax.random.randint(k_t, (B,), 0, OUT_DIM, jnp.int32)
    targets = targets.at[-1].set(-1)               # exercise ignore_index=-1

    out = network_b_forward(params, x, targets=targets, return_dict=True)
    jax.block_until_ready(out.logits)
    jax.block_until_ready(out.loss)

    # logits-only path (targets=None)
    loss2, logits2 = network_b_forward(params, x, targets=None, return_dict=False)
    assert loss2 is None
    jax.block_until_ready(logits2)

    # Tight check vs. a reference using the same bf16 MXU casts; loose check vs.
    # the pure-f32 PyTorch-equivalent math (bf16 rounding of weights/activations).
    bf_loss, bf_logits = _reference(params, x, targets, compute_dtype=jnp.bfloat16)
    f32_loss, f32_logits = _reference(params, x, targets, compute_dtype=jnp.float32)

    assert jnp.allclose(out.logits, bf_logits, atol=2e-2, rtol=2e-2)
    assert jnp.allclose(out.loss, bf_loss, atol=2e-2, rtol=2e-2)
    assert jnp.allclose(out.logits, f32_logits, atol=1e-1, rtol=1e-1)
    assert jnp.allclose(out.loss, f32_loss, atol=1e-1, rtol=1e-1)
    assert jnp.allclose(logits2, out.logits, atol=1e-5, rtol=1e-5)

    print("KERNEL_OK")
</pallas_src>

<mosaic_0001>
module attributes {stable_mosaic.version = 11 : i64} {
  func.func @_mlp_ce_kernel(%arg0: i32, %arg1: memref<16x128xbf16, #tpu.memory_space<vmem>>, %arg2: memref<16x1xi32, #tpu.memory_space<vmem>>, %arg3: memref<128x128xbf16, #tpu.memory_space<vmem>>, %arg4: memref<1x128xf32, #tpu.memory_space<vmem>>, %arg5: memref<128x128xbf16, #tpu.memory_space<vmem>>, %arg6: memref<1x128xf32, #tpu.memory_space<vmem>>, %arg7: memref<128x128xbf16, #tpu.memory_space<vmem>>, %arg8: memref<1x128xf32, #tpu.memory_space<vmem>>, %arg9: memref<16x128xf32, #tpu.memory_space<vmem>>, %arg10: memref<16x1xf32, #tpu.memory_space<vmem>>) attributes {dimension_semantics = [#tpu.dimension_semantics<parallel>], iteration_bounds = array<i64: 1>, scalar_prefetch = 0 : i64, scratch_operands = 0 : i64, tpu.core_type = #tpu.core_type<tc>, window_params = [{transform_indices = @transform_0, window_bounds = array<i64: 16, 128>}, {transform_indices = @transform_1, window_bounds = array<i64: 16, 1>}, {pipeline_mode = #tpu.pipeline_mode<synchronous>, transform_indices = @transform_2, window_bounds = array<i64: 128, 128>}, {pipeline_mode = #tpu.pipeline_mode<synchronous>, transform_indices = @transform_3, window_bounds = array<i64: 1, 128>}, {pipeline_mode = #tpu.pipeline_mode<synchronous>, transform_indices = @transform_4, window_bounds = array<i64: 128, 128>}, {pipeline_mode = #tpu.pipeline_mode<synchronous>, transform_indices = @transform_5, window_bounds = array<i64: 1, 128>}, {pipeline_mode = #tpu.pipeline_mode<synchronous>, transform_indices = @transform_6, window_bounds = array<i64: 128, 128>}, {pipeline_mode = #tpu.pipeline_mode<synchronous>, transform_indices = @transform_7, window_bounds = array<i64: 1, 128>}, {transform_indices = @transform_8, window_bounds = array<i64: 16, 128>}, {transform_indices = @transform_9, window_bounds = array<i64: 16, 1>}]} {
    %c0 = arith.constant 0 : index
    %c0_0 = arith.constant 0 : index
    %0 = vector.load %arg1[%c0, %c0_0] : memref<16x128xbf16, #tpu.memory_space<vmem>>, vector<16x128xbf16>
    %c0_1 = arith.constant 0 : index
    %c0_2 = arith.constant 0 : index
    %1 = vector.load %arg3[%c0_1, %c0_2] : memref<128x128xbf16, #tpu.memory_space<vmem>>, vector<128x128xbf16>
    %cst = arith.constant dense<0.000000e+00> : vector<16x128xf32>
    %2 = tpu.matmul %0, %1, %cst {dimension_numbers = #tpu.dot_dimension_numbers<[1], [0], [0], [1], [0, 0, 1, 1], [], []>} : vector<16x128xbf16>, vector<128x128xbf16>, vector<16x128xf32> -> vector<16x128xf32>
    %c0_3 = arith.constant 0 : index
    %c0_4 = arith.constant 0 : index
    %3 = vector.load %arg4[%c0_3, %c0_4] : memref<1x128xf32, #tpu.memory_space<vmem>>, vector<1x128xf32>
    %4 = vector.broadcast %3 : vector<1x128xf32> to vector<16x128xf32>
    %5 = arith.addf %2, %4 : vector<16x128xf32>
    %cst_5 = arith.constant 0.000000e+00 : f32
    %6 = vector.broadcast %cst_5 : f32 to vector<16x128xf32>
    %7 = arith.maximumf %5, %6 : vector<16x128xf32>
    %8 = arith.truncf %7 : vector<16x128xf32> to vector<16x128xbf16>
    %c0_6 = arith.constant 0 : index
    %c0_7 = arith.constant 0 : index
    %9 = vector.load %arg5[%c0_6, %c0_7] : memref<128x128xbf16, #tpu.memory_space<vmem>>, vector<128x128xbf16>
    %cst_8 = arith.constant dense<0.000000e+00> : vector<16x128xf32>
    %10 = tpu.matmul %8, %9, %cst_8 {dimension_numbers = #tpu.dot_dimension_numbers<[1], [0], [0], [1], [0, 0, 1, 1], [], []>} : vector<16x128xbf16>, vector<128x128xbf16>, vector<16x128xf32> -> vector<16x128xf32>
    %c0_9 = arith.constant 0 : index
    %c0_10 = arith.constant 0 : index
    %11 = vector.load %arg6[%c0_9, %c0_10] : memref<1x128xf32, #tpu.memory_space<vmem>>, vector<1x128xf32>
    %12 = vector.broadcast %11 : vector<1x128xf32> to vector<16x128xf32>
    %13 = arith.addf %10, %12 : vector<16x128xf32>
    %cst_11 = arith.constant 0.000000e+00 : f32
    %14 = vector.broadcast %cst_11 : f32 to vector<16x128xf32>
    %15 = arith.maximumf %13, %14 : vector<16x128xf32>
    %16 = arith.truncf %15 : vector<16x128xf32> to vector<16x128xbf16>
    %c0_12 = arith.constant 0 : index
    %c0_13 = arith.constant 0 : index
    %17 = vector.load %arg7[%c0_12, %c0_13] : memref<128x128xbf16, #tpu.memory_space<vmem>>, vector<128x128xbf16>
    %cst_14 = arith.constant dense<0.000000e+00> : vector<16x128xf32>
    %18 = tpu.matmul %16, %17, %cst_14 {dimension_numbers = #tpu.dot_dimension_numbers<[1], [0], [0], [1], [0, 0, 1, 1], [], []>} : vector<16x128xbf16>, vector<128x128xbf16>, vector<16x128xf32> -> vector<16x128xf32>
    %c0_15 = arith.constant 0 : index
    %c0_16 = arith.constant 0 : index
    %19 = vector.load %arg8[%c0_15, %c0_16] : memref<1x128xf32, #tpu.memory_space<vmem>>, vector<1x128xf32>
    %20 = vector.broadcast %19 : vector<1x128xf32> to vector<16x128xf32>
    %21 = arith.addf %18, %20 : vector<16x128xf32>
    %c0_17 = arith.constant 0 : index
    %c0_18 = arith.constant 0 : index
    %22 = vector.load %arg9[%c0_17, %c0_18] : memref<16x128xf32, #tpu.memory_space<vmem>>, vector<16x128xf32>
    tpu.vector_store %arg9[%c0_17, %c0_18], %21 {strides = array<i32>} : memref<16x128xf32, #tpu.memory_space<vmem>>, vector<16x128xf32>,
    %23 = tpu.iota {dimensions = array<i32: 1>} : vector<16x128xi32>
    %c16_i32 = arith.constant 16 : i32
    %24 = vector.broadcast %c16_i32 : i32 to vector<16x128xi32>
    %25 = arith.cmpi slt, %23, %24 : vector<16x128xi32>
    %cst_19 = arith.constant -1.000000e+30 : f32
    %26 = vector.broadcast %cst_19 : f32 to vector<16x128xf32>
    %27 = arith.select %25, %21, %26 : vector<16x128xi1>, vector<16x128xf32>
    %cst_20 = arith.constant dense<0xFF800000> : vector<16xf32>
    %28 = vector.multi_reduction <maximumf>, %27, %cst_20 [1] : vector<16x128xf32> to vector<16xf32>
    %29 = vector.shape_cast %28 : vector<16xf32> to vector<16x1xf32>
    %30 = vector.broadcast %29 : vector<16x1xf32> to vector<16x128xf32>
    %31 = arith.subf %27, %30 : vector<16x128xf32>
    %32 = math.exp %31 : vector<16x128xf32>
    %cst_21 = arith.constant dense<0.000000e+00> : vector<16xf32>
    %33 = vector.multi_reduction <add>, %32, %cst_21 [1] : vector<16x128xf32> to vector<16xf32>
    %34 = vector.shape_cast %33 : vector<16xf32> to vector<16x1xf32>
    %35 = math.log %34 : vector<16x1xf32>
    %36 = arith.addf %29, %35 : vector<16x1xf32>
    %c0_22 = arith.constant 0 : index
    %c0_23 = arith.constant 0 : index
    %37 = vector.load %arg2[%c0_22, %c0_23] : memref<16x1xi32, #tpu.memory_space<vmem>>, vector<16x1xi32>
    %38 = vector.broadcast %37 : vector<16x1xi32> to vector<16x128xi32>
    %39 = arith.cmpi eq, %23, %38 : vector<16x128xi32>
    %cst_24 = arith.constant 0.000000e+00 : f32
    %40 = vector.broadcast %cst_24 : f32 to vector<16x128xf32>
    %41 = arith.select %39, %21, %40 : vector<16x128xi1>, vector<16x128xf32>
    %cst_25 = arith.constant dense<0.000000e+00> : vector<16xf32>
    %42 = vector.multi_reduction <add>, %41, %cst_25 [1] : vector<16x128xf32> to vector<16xf32>
    %43 = vector.shape_cast %42 : vector<16xf32> to vector<16x1xf32>
    %c-1_i32 = arith.constant -1 : i32
    %44 = vector.broadcast %c-1_i32 : i32 to vector<16x1xi32>
    %45 = arith.cmpi ne, %37, %44 : vector<16x1xi32>
    %46 = arith.subf %36, %43 : vector<16x1xf32>
    %cst_26 = arith.constant 0.000000e+00 : f32
    %47 = vector.broadcast %cst_26 : f32 to vector<16x1xf32>
    %48 = arith.select %45, %46, %47 : vector<16x1xi1>, vector<16x1xf32>
    %c0_27 = arith.constant 0 : index
    %c0_28 = arith.constant 0 : index
    %49 = vector.load %arg10[%c0_27, %c0_28] : memref<16x1xf32, #tpu.memory_space<vmem>>, vector<16x1xf32>
    tpu.vector_store %arg10[%c0_27, %c0_28], %48 {strides = array<i32>} : memref<16x1xf32, #tpu.memory_space<vmem>>, vector<16x1xf32>,
    return
  }
  func.func @transform_0(%arg0: i32) -> (i32, i32) {
    %c0_i32 = arith.constant 0 : i32
    %c0_i32_0 = arith.constant 0 : i32
    return %arg0, %c0_i32 : i32, i32
  }
  func.func @transform_1(%arg0: i32) -> (i32, i32) {
    %c0_i32 = arith.constant 0 : i32
    %c0_i32_0 = arith.constant 0 : i32
    return %arg0, %c0_i32 : i32, i32
  }
  func.func @transform_2(%arg0: i32) -> (i32, i32) {
    %c0_i32 = arith.constant 0 : i32
    %c0_i32_0 = arith.constant 0 : i32
    %c0_i32_1 = arith.constant 0 : i32
    return %c0_i32, %c0_i32_0 : i32, i32
  }
  func.func @transform_3(%arg0: i32) -> (i32, i32) {
    %c0_i32 = arith.constant 0 : i32
    %c0_i32_0 = arith.constant 0 : i32
    %c0_i32_1 = arith.constant 0 : i32
    return %c0_i32, %c0_i32_0 : i32, i32
  }
  func.func @transform_4(%arg0: i32) -> (i32, i32) {
    %c0_i32 = arith.constant 0 : i32
    %c0_i32_0 = arith.constant 0 : i32
    %c0_i32_1 = arith.constant 0 : i32
    return %c0_i32, %c0_i32_0 : i32, i32
  }
  func.func @transform_5(%arg0: i32) -> (i32, i32) {
    %c0_i32 = arith.constant 0 : i32
    %c0_i32_0 = arith.constant 0 : i32
    %c0_i32_1 = arith.constant 0 : i32
    return %c0_i32, %c0_i32_0 : i32, i32
  }
  func.func @transform_6(%arg0: i32) -> (i32, i32) {
    %c0_i32 = arith.constant 0 : i32
    %c0_i32_0 = arith.constant 0 : i32
    %c0_i32_1 = arith.constant 0 : i32
    return %c0_i32, %c0_i32_0 : i32, i32
  }
  func.func @transform_7(%arg0: i32) -> (i32, i32) {
    %c0_i32 = arith.constant 0 : i32
    %c0_i32_0 = arith.constant 0 : i32
    %c0_i32_1 = arith.constant 0 : i32
    return %c0_i32, %c0_i32_0 : i32, i32
  }
  func.func @transform_8(%arg0: i32) -> (i32, i32) {
    %c0_i32 = arith.constant 0 : i32
    %c0_i32_0 = arith.constant 0 : i32
    return %arg0, %c0_i32 : i32, i32
  }
  func.func @transform_9(%arg0: i32) -> (i32, i32) {
    %c0_i32 = arith.constant 0 : i32
    %c0_i32_0 = arith.constant 0 : i32
    return %arg0, %c0_i32 : i32, i32
  }
}

</mosaic_0001>

<bundles_post_ra>
// kernel: tpu_custom_call.1
= control target key start
LH: loop header
LB: loop body
LE: loop exit
PB: predicated region body
PF: predicated region fallthrough
CT: control target
= control target key end

     0   :  { %15 = vsyncpa [#allocation3], 0  ;;  %s880_s0 = inlined_call_operand.vmem [shape: bf16[16,128], index: 0, kind: input, shape index: {}]   ;;  %s881_s1 = inlined_call_operand.vmem [shape: s32[16,1], index: 1, kind: input, shape index: {}]   ;;  %s882_s2 = inlined_call_operand.hbm [shape: bf16[128,128], index: 2, kind: input, shape index: {}]   ;;  %s883_s3 = inlined_call_operand.vmem [shape: f32[1,128], index: 3, kind: input, shape index: {}]   ;;  %s884_s4 = inlined_call_operand.hbm [shape: bf16[128,128], index: 4, kind: input, shape index: {}]   ;;  %s885_s5 = inlined_call_operand.vmem [shape: f32[1,128], index: 5, kind: input, shape index: {}]   ;;  %s886_s6 = inlined_call_operand.hbm [shape: bf16[128,128], index: 6, kind: input, shape index: {}]   ;;  %s887_s7 = inlined_call_operand.vmem [shape: f32[1,128], index: 7, kind: input, shape index: {}]   ;;  %s888_s8 = inlined_call_operand.hbm [shape: f32[16,128], index: 8, kind: output, shape index: {0}]   ;;  %s889_s9 = inlined_call_operand.vmem [shape: f32[16,1], index: 9, kind: output, shape index: {1}]  }
   0x1   :  { %16 = vsyncpa [#allocation6], 0 }
   0x2   :  { %17 = vsyncpa [#allocation4], 0  ;;  %s745_s30 = smov [#allocation5]   ;;  %s746_s11 = smov [#allocation2]  }
   0x3   :  { %s41_s10 = sshll.u32 %s745_s30, 4  ;;  %s27_s12 = sshll.u32 %s746_s11, 4  ;;  %s42_s10 = int_to_ptr.vmem [resolvable:$true] %s41_s10  ;;  %s28_s12 = int_to_ptr.vmem [resolvable:$true] %s27_s12 }
   0x4   :  { %s667_s13 = scalar_lea.vmem %s42_s10, 1024  ;;  %p672_p1 = scmp.lt.s32.totalorder %s42_s10, %s42_s10 }
   0x5   :  { %p668_p0 = scmp.ne.s32.totalorder %s42_s10, %s667_s13  ;;  %p673_p2 = scmp.lt.s32.totalorder %s667_s13, %s667_s13 }
   0x7   :  { %p674_p3 = por %p673_p2, %p672_p1 }
   0x9   :  { %p675_p4 = pnand %p674_p3, %p668_p0 }
   0xb   :  { %678 = shalt.err (!%p675_p4)
}
   0xc   :  { %s747_s14 = smov 64   ;;  %s748_s15 = smov 4  }
   0xd   :  { %47 = dma.hbm_to_vmem [thread:$0]  %s884_s4, 1024, %s42_s10, [#allocation6], %s747_s14, %s747_s14, %s748_s15  }
   0xe   :  { %s687_s18 = scalar_lea.vmem %s28_s12, 1024  ;;  %p692_p6 = scmp.lt.s32.totalorder %s28_s12, %s28_s12 }
   0xf   :  { %p688_p5 = scmp.ne.s32.totalorder %s28_s12, %s687_s18  ;;  %p693_p7 = scmp.lt.s32.totalorder %s687_s18, %s687_s18 }
  0x11   :  { %p694_p8 = por %p693_p7, %p692_p6 }
  0x13   :  { %p695_p9 = pnand %p694_p8, %p688_p5 }
  0x15   :  { %698 = shalt.err (!%p695_p9)
}
  0x16   :  { %33 = dma.hbm_to_vmem [thread:$0]  %s882_s2, 1024, %s28_s12, [#allocation3], %s747_s14, %s747_s14, %s748_s15  }
  0x17   :  { %s749_s21 = smov [#allocation7]  }
  0x18   :  { %s55_s22 = sshll.u32 %s749_s21, 4  ;;  %s56_s22 = int_to_ptr.vmem [resolvable:$true] %s55_s22 }
  0x19   :  { %s707_s23 = scalar_lea.vmem %s56_s22, 1024  ;;  %p712_p11 = scmp.lt.s32.totalorder %s56_s22, %s56_s22 }
  0x1a   :  { %p708_p10 = scmp.ne.s32.totalorder %s56_s22, %s707_s23  ;;  %p713_p12 = scmp.lt.s32.totalorder %s707_s23, %s707_s23 }
  0x1c   :  { %p714_p13 = por %p713_p12, %p712_p11 }
  0x1e   :  { %p715_p0 = pnand %p714_p13, %p708_p10 }
  0x20   :  { %718 = shalt.err (!%p715_p0)
}
  0x21   :  { %61 = dma.hbm_to_vmem [thread:$0]  %s886_s6, 1024, %s56_s22, [#allocation6], %s747_s14, %s747_s14, %s748_s15  }
  0x22   :  { %739 = dma.done.wait [#allocation3], 1024  }
  0x23   :  { %740 = vsyncadd [#allocation3], 4294966272 }
  0x24   :  { %741 = dma.done.wait [#allocation6], 2048  }
  0x25   :  { %742 = vsyncadd [#allocation6], 4294965248  ;;  %v750_v0 = vmov 0.0   ;;  %vm751_vm0 = vmmov 0   ;;  %v626_v1 = vld [vmem:[#allocation2 + $0x38] sm:$0xff]   ;;  %v627_v2 = vld [vmem:[#allocation2 + $0x30] sm:$0xff]   ;;  %v426_v49 = vlaneseq }
  0x26   :  { %553 = vmatprep.subr.bf16.mxu0 %v750_v0  ;;  %569 = vmatprep.mubr.msk.bf16.mxu0 %vm751_vm0, %v750_v0  ;;  %v628_v3 = vld [vmem:[#allocation2 + $0x28] sm:$0xff]   ;;  %v635_v4 = vld [vmem:[#allocation5 + $0x38] sm:$0xff]   ;;  %v629_v5 = vld [vmem:[#allocation2 + $0x20] sm:$0xff]   ;;  %v752_v37 = vmov 0  }
  0x27   :  { %573 = vmatprep.subr.bf16.mxu1 %v750_v0  ;;  %589 = vmatprep.mubr.msk.bf16.mxu1 %vm751_vm0, %v750_v0  ;;  %v636_v6 = vld [vmem:[#allocation5 + $0x30] sm:$0xff]   ;;  %v630_v7 = vld [vmem:[#allocation2 + $0x18] sm:$0xff]   ;;  %v637_v8 = vld [vmem:[#allocation5 + $0x28] sm:$0xff]   ;;  %v427_v51 = vand.u32 127, %v426_v49 }
  0x28   :  { %554 = vmatpush3.bf16.msra.mxu0 %v626_v1  ;;  %574 = vmatpush3.bf16.msra.mxu1 %v635_v4  ;;  %v631_v9 = vld [vmem:[#allocation2 + $0x10] sm:$0xff]   ;;  %v638_v10 = vld [vmem:[#allocation5 + $0x20] sm:$0xff]   ;;  %v632_v11 = vld [vmem:[#allocation2 + $0x8] sm:$0xff]  }
  0x29   :  { %555 = vmatprep.subr.bf16.mxu0 %v750_v0  ;;  %575 = vmatprep.subr.bf16.mxu1 %v750_v0  ;;  %v639_v12 = vld [vmem:[#allocation5 + $0x18] sm:$0xff]   ;;  %v633_v13 = vld [vmem:[#allocation2] sm:$0xff]   ;;  %v640_v15 = vld [vmem:[#allocation5 + $0x10] sm:$0xff]   ;;  %vm428_vm2 = vcmp.lt.s32.totalorder %v427_v51, 16 }
  0x2a   :  { %v634_v14 = vld [vmem:[%s880_s0] sm:$0xff]   ;;  %v641_v16 = vld [vmem:[#allocation5 + $0x8] sm:$0xff]   ;;  %v643_v18 = vld [vmem:[#allocation7 + $0x38] sm:$0xff]   ;;  %624 = vset.pattern.permute.xlu1 %v752_v37  ;;  %625 = vset.pattern.permute.xlu0 %v752_v37 }
  0x2b   :  { %v642_v17 = vld [vmem:[#allocation5] sm:$0xff]   ;;  %v644_v19 = vld [vmem:[#allocation7 + $0x30] sm:$0xff]   ;;  %v645_v20 = vld [vmem:[#allocation7 + $0x28] sm:$0xff]  }
  0x2c   :  { %556 = vmatpush3.bf16.msra.mxu0 %v627_v2  ;;  %576 = vmatpush3.bf16.msra.mxu1 %v636_v6  ;;  %v646_v21 = vld [vmem:[#allocation7 + $0x20] sm:$0xff]   ;;  %v647_v22 = vld [vmem:[#allocation7 + $0x18] sm:$0xff]   ;;  %v648_v33 = vld [vmem:[#allocation7 + $0x10] sm:$0xff]  }
  0x2d   :  { %557 = vmatprep.subr.bf16.mxu0 %v750_v0  ;;  %577 = vmatprep.subr.bf16.mxu1 %v750_v0  ;;  %v498_v23 = vld [vmem:[%s883_s3] ss:$0 sm:$0xff]  ;;  %v649_v34 = vld [vmem:[#allocation7 + $0x8] sm:$0xff]  }
  0x2e   :  { %v650_v35 = vld [vmem:[#allocation7] sm:$0xff]   ;;  %v860_v38 = vld [vmem:[%s881_s1 + $0x8] sm:$0xff] }
  0x2f   :  { %v854_v36 = vld [vmem:[%s881_s1] sm:$0xff] }
  0x30   :  { %558 = vmatpush3.bf16.msra.mxu0 %v628_v3  ;;  %578 = vmatpush3.bf16.msra.mxu1 %v637_v8  ;;  %v508_v39 = vld [vmem:[%s885_s5] ss:$0 sm:$0xff]  ;;  %s753_s5 = smov [#allocation8]  }
  0x31   :  { %559 = vmatprep.subr.bf16.mxu0 %v750_v0  ;;  %579 = vmatprep.subr.bf16.mxu1 %v750_v0  ;;  %v517_v52 = vld [vmem:[%s887_s7] ss:$0 sm:$0xff]  ;;  %s481_s7 = sshll.u32 %s753_s5, 4  ;;  %s482_s7 = int_to_ptr.vmem [resolvable:$true] %s481_s7 }
  0x32   :  { %454 = vperm.xlu1 %624, %v854_v36   ;;  %s719_s11 = scalar_lea.vmem %s482_s7, 256  ;;  %p724_p2 = scmp.lt.s32.totalorder %s482_s7, %s482_s7 }
  0x33   :  { %p720_p1 = scmp.ne.s32.totalorder %s482_s7, %s719_s11  ;;  %p725_p3 = scmp.lt.s32.totalorder %s719_s11, %s719_s11 }
  0x34   :  { %560 = vmatpush3.bf16.msra.mxu0 %v629_v5  ;;  %580 = vmatpush3.bf16.msra.mxu1 %v638_v10 }
  0x35   :  { %561 = vmatprep.subr.bf16.mxu0 %v750_v0  ;;  %581 = vmatprep.subr.bf16.mxu1 %v750_v0  ;;  %p726_p4 = por %p725_p3, %p724_p2 }
  0x36   :  { %457 = vperm.xlu1 %624, %v860_v38  }
  0x37   :  { %p727_p5 = pnand %p726_p4, %p720_p1 }
  0x38   :  { %562 = vmatpush3.bf16.msra.mxu0 %v630_v7  ;;  %582 = vmatpush3.bf16.msra.mxu1 %v639_v12 }
  0x39   :  { %563 = vmatprep.subr.bf16.mxu0 %v750_v0  ;;  %583 = vmatprep.subr.bf16.mxu1 %v750_v0 }
  0x3c   :  { %564 = vmatpush3.bf16.msra.mxu0 %v631_v9  ;;  %584 = vmatpush3.bf16.msra.mxu1 %v640_v15 }
  0x3d   :  { %565 = vmatprep.subr.bf16.mxu0 %v750_v0  ;;  %585 = vmatprep.subr.bf16.mxu1 %v750_v0 }
  0x40   :  { %566 = vmatpush3.bf16.msra.mxu0 %v632_v11  ;;  %586 = vmatpush3.bf16.msra.mxu1 %v641_v16 }
  0x41   :  { %567 = vmatprep.subr.bf16.mxu0 %v750_v0  ;;  %587 = vmatprep.subr.bf16.mxu1 %v750_v0 }
  0x44   :  { %568 = vmatpush3.bf16.msra.mxu0 %v633_v13  ;;  %588 = vmatpush3.bf16.msra.mxu1 %v642_v17 }
  0x45   :  { %593 = vmatprep.subr.bf16.mxu0 %v750_v0 }
  0x47   :  { %570 = vmatmul.mubr.bf16.vlgmr.msra.gmra.mxu0 %v634_v14 }
  0x48   :  { %609 = vmatprep.mubr.msk.bf16.mxu0 %vm751_vm0, %v750_v0  ;;  %594 = vmatpush3.bf16.msra.mxu0 %v643_v18 }
  0x49   :  { %595 = vmatprep.subr.bf16.mxu0 %v750_v0 }
  0x4c   :  { %596 = vmatpush3.bf16.msra.mxu0 %v644_v19 }
  0x4d   :  { %597 = vmatprep.subr.bf16.mxu0 %v750_v0 }
  0x50   :  { %598 = vmatpush3.bf16.msra.mxu0 %v645_v20 }
  0x51   :  { %599 = vmatprep.subr.bf16.mxu0 %v750_v0 }
  0x54   :  { %600 = vmatpush3.bf16.msra.mxu0 %v646_v21 }
  0x55   :  { %601 = vmatprep.subr.bf16.mxu0 %v750_v0 }
  0x58   :  { %602 = vmatpush3.bf16.msra.mxu0 %v647_v22 }
  0x59   :  { %603 = vmatprep.subr.bf16.mxu0 %v750_v0 }
  0x5c   :  { %604 = vmatpush3.bf16.msra.mxu0 %v648_v33 }
  0x5d   :  { %605 = vmatprep.subr.bf16.mxu0 %v750_v0 }
  0x60   :  { %606 = vmatpush3.bf16.msra.mxu0 %v649_v34 }
  0x61   :  { %607 = vmatprep.subr.bf16.mxu0 %v750_v0 }
  0x64   :  { %608 = vmatpush3.bf16.msra.mxu0 %v650_v35 }
  0xad   :  { %v455_v50 = vpop.permute.xlu1 %454 }
  0xae   :  { %vm459_vm1 = vcmp.eq.s32.totalorder %v427_v51, %v455_v50 }
  0xb1   :  { %v458_v55 = vpop.permute.xlu1 %457 }
  0xb2   :  { %vm460_vm3 = vcmp.eq.s32.totalorder %v427_v51, %v458_v55 }
 0x107   :  { %v187_v24 = vpop.f32.mrf.mxu0 }
 0x108   :  { %v188_v26 = vadd.f32 %v498_v23, %v187_v24 }
 0x109   :  { %v571_v25 = vpop.f32.mrf.mxu0 }
 0x10a   :  { %v194_v30 = vmax.f32 %v188_v26, 0.0 }
 0x10b   :  { %v190_v27 = vpop.f32.mrf.mxu0 }
 0x10c   :  { %v191_v28 = vadd.f32 %v498_v23, %v190_v27 }
 0x10d   :  { %v572_v29 = vpop.f32.mrf.mxu0 }
 0x10e   :  { %v195_v31 = vmax.f32 %v191_v28, 0.0 }
 0x110   :  { %v196_v32 = vpack.c.bf16 %v195_v31, %v194_v30 }
 0x112   :  { %590 = vmatmul.mubr.bf16.vlgmr.msra.gmra.mxu1 %v196_v32 }
 0x1d2   :  { %v302_v40 = vpop.f32.mrf.mxu1 }
 0x1d3   :  { %v303_v42 = vadd.f32 %v508_v39, %v302_v40 }
 0x1d4   :  { %v591_v41 = vpop.f32.mrf.mxu1 }
 0x1d5   :  { %v309_v46 = vmax.f32 %v303_v42, 0.0 }
 0x1d6   :  { %v305_v43 = vpop.f32.mrf.mxu1 }
 0x1d7   :  { %v306_v44 = vadd.f32 %v508_v39, %v305_v43 }
 0x1d8   :  { %v592_v45 = vpop.f32.mrf.mxu1 }
 0x1d9   :  { %v310_v47 = vmax.f32 %v306_v44, 0.0 }
 0x1db   :  { %v311_v48 = vpack.c.bf16 %v310_v47, %v309_v46 }
 0x1dd   :  { %610 = vmatmul.mubr.bf16.vlgmr.msra.gmra.mxu0 %v311_v48 }
 0x29d   :  { %v417_v53 = vpop.f32.mrf.mxu0 }
 0x29e   :  { %v418_v54 = vadd.f32 %v517_v52, %v417_v53 }
 0x29f   :  { %v611_v56 = vpop.f32.mrf.mxu0 }
 0x2a0   :  { %424 = vst [vmem:[#allocation8] sm:$0xff] %v418_v54  ;;  %v429_v57 = vsel %vm428_vm2, %v418_v54, -1e+30  ;;  %v461_v58 = vsel %vm459_vm1, %v418_v54, 0.0 }
 0x2a1   :  { %431 = vmax.xlane.f32.xlu0 %v429_v57  ;;  %v420_v59 = vpop.f32.mrf.mxu0 }
 0x2a2   :  { %v421_v60 = vadd.f32 %v517_v52, %v420_v59 }
 0x2a3   :  { %v612_v61 = vpop.f32.mrf.mxu0 }
 0x2a4   :  { %425 = vst [vmem:[#allocation8 + $0x8] sm:$0xff] %v421_v60  ;;  %v430_v62 = vsel %vm428_vm2, %v421_v60, -1e+30  ;;  %v462_v63 = vsel %vm460_vm3, %v421_v60, 0.0 }
 0x2a5   :  { %433 = vmax.xlane.f32.xlu0 %v430_v62 }
 0x32a   :  { %v432_v0 = vpop.xlane.xlu0 %431 }
 0x32b   :  { %v435_v1 = vsub.f32 %v429_v57, %v432_v0 }
 0x32d   :  { %v437_v2 = vmul.f32 1.442695, %v435_v1 }
 0x32e   :  { %v434_v3 = vpop.xlane.xlu0 %433 }
 0x32f   :  { %651 = vpow2.f32 %v437_v2  ;;  %v436_v4 = vsub.f32 %v430_v62, %v434_v3 }
 0x331   :  { %v439_v5 = vmul.f32 1.442695, %v436_v4 }
 0x333   :  { %653 = vpow2.f32 %v439_v5 }
 0x33c   :  { %v652_v6 = vpop.eup %651 }
 0x33d   :  { %441 = vadd.xlane.f32.xlu0 %v652_v6 }
 0x340   :  { %v654_v7 = vpop.eup %653 }
 0x341   :  { %463 = vadd.xlane.f32.xlu0 %v461_v58  ;;  %443 = vadd.xlane.f32.xlu1 %v654_v7 }
 0x345   :  { %465 = vadd.xlane.f32.xlu0 %v462_v63 }
 0x346   :  { %730 = shalt.err (!%p727_p5)
}
 0x347   :  { %s754_s12 = smov 128   ;;  %s755_s13 = smov 8   ;;  %vm467_vm4 = vcmp.ne.s32.totalorder %v854_v36, 4294967295  ;;  %vm473_vm5 = vcmask 7168   ;;  %vm468_vm6 = vcmp.ne.s32.totalorder %v860_v38, 4294967295 }
 0x348   :  { %487 = dma.vmem_to_hbm [thread:$0]  %s482_s7, 256, %s888_s8, [#allocation4], %s754_s12, %s754_s12, %s755_s13  }
 0x3c6   :  { %v442_v8 = vpop.xlane.xlu0 %441 }
 0x3c7   :  { %655 = vlog2.f32 %v442_v8 }
 0x3ca   :  { %v444_v9 = vpop.xlane.xlu1 %443  ;;  %v464_v12 = vpop.xlane.xlu0 %463 }
 0x3cb   :  { %657 = vlog2.f32 %v444_v9 }
 0x3ce   :  { %v466_v19 = vpop.xlane.xlu0 %465 }
 0x3d4   :  { %v656_v10 = vpop.eup %655 }
 0x3d5   :  { %v446_v11 = vmul.f32 0.6931472, %v656_v10 }
 0x3d7   :  { %v449_v13 = vadd.f32 %v446_v11, %v432_v0 }
 0x3d8   :  { %v658_v14 = vpop.eup %657 }
 0x3d9   :  { %v448_v15 = vmul.f32 0.6931472, %v658_v14  ;;  %v469_v16 = vsub.f32 %v449_v13, %v464_v12 }
 0x3db   :  { %v471_v17 = vsel %vm467_vm4, %v469_v16, 0.0  ;;  %v450_v18 = vadd.f32 %v448_v15, %v434_v3 }
 0x3dc   :  { %474 = vst.msk [vmem:[%s889_s9] sm:$0xff] %vm473_vm5, %v471_v17 }
 0x3dd   :  { %v470_v20 = vsub.f32 %v450_v18, %v466_v19 }
 0x3df   :  { %v472_v21 = vsel %vm468_vm6, %v470_v20, 0.0 }
 0x3e0   :  { %475 = vst.msk [vmem:[%s889_s9 + $0x8] sm:$0xff] %vm473_vm5, %v472_v21 }
 0x3e1   :  { %743 = dma.done.wait [#allocation4], 256  }
 0x3e2   :  { %744 = vsyncadd [#allocation4], 4294967040 }
 0x3e3   :  { %495 = vsyncpa [#allocation3], 1 }
 0x3e4   :  { %496 = vsyncpa [#allocation6], 1 }
 0x3e5   :  { %497 = vsyncpa [#allocation4], 1 }

</bundles_post_ra>
